<compile_context>
chip_gen: v7x
topology: tpu7x:2x2x1
jax: 0.10.0
libtpu: 0.0.40
codegen_flags: <defaults>
</compile_context>

<pallas_src>
import math

import jax
import jax.numpy as jnp
from jax import lax
from jax.experimental import pallas as pl
from jax.experimental.pallas import tpu as pltpu


def make_mha_kernel(L, E, H, D, TQ, num_q_blocks, scale):
    """Build a kernel closure with static shape params."""
    HD = H * D

    def mha_kernel(x_ref, wqkv_ref, wo_ref, bo_ref, o_ref):
        # x_ref:    (L, E)      bf16  full sequence for the current batch element
        # wqkv_ref: (E, 3*H*D)  bf16  fused [Wq | Wk | Wv]
        # wo_ref:   (H*D, E)    bf16
        # bo_ref:   (1, E)      f32
        # o_ref:    (TQ, E)     f32

        x = x_ref[...]  # (L, E) bf16

        # Fused Q/K/V projection: a single wide MXU matmul, bf16 in / f32 accumulate.
        qkv = jnp.dot(x, wqkv_ref[...], preferred_element_type=jnp.float32)  # (L, 3HD) f32
        qkv_bf = qkv.astype(jnp.bfloat16)  # cast once for downstream MXU use

        # Rows of Q belonging to the current query block.
        if num_q_blocks == 1:
            q_rows = qkv_bf
        else:
            q_start = pl.multiple_of(pl.program_id(1) * TQ, TQ)
            q_rows = lax.dynamic_slice_in_dim(qkv_bf, q_start, TQ, axis=0)

        q_bf = q_rows[:, 0:HD]            # (TQ, HD) bf16
        k_bf = qkv_bf[:, HD:2 * HD]       # (L,  HD) bf16
        v_bf = qkv_bf[:, 2 * HD:3 * HD]   # (L,  HD) bf16

        acc = jnp.zeros((TQ, E), jnp.float32)

        # H is small and static -> unrolled at trace time.  No concatenate: each head's
        # output is folded straight into the fc_out accumulator via Wo's per-head slice.
        for h in range(H):
            qh = q_bf[:, h * D:(h + 1) * D]   # (TQ, D)
            kh = k_bf[:, h * D:(h + 1) * D]   # (L,  D)
            vh = v_bf[:, h * D:(h + 1) * D]   # (L,  D)

            # energy = q @ k^T, contracting the last dims (no explicit transpose).
            energy = lax.dot_general(
                qh, kh, (((1,), (1,)), ((), ())),
                preferred_element_type=jnp.float32,
            ) * scale                                             # (TQ, L) f32

            # Numerically-stable softmax over the key axis, all in f32.
            m = jnp.max(energy, axis=-1, keepdims=True)
            p = jnp.exp(energy - m)
            inv = pl.reciprocal(jnp.sum(p, axis=-1, keepdims=True), approx=True)
            attn = p * inv                                        # (TQ, L) f32

            # attn @ v  (bf16 operands, f32 accumulation)
            oh = jnp.dot(attn.astype(jnp.bfloat16), vh,
                         preferred_element_type=jnp.float32)      # (TQ, D) f32

            # Fold this head's contribution into fc_out directly.
            acc = acc + jnp.dot(oh.astype(jnp.bfloat16),
                                wo_ref[h * D:(h + 1) * D, :],
                                preferred_element_type=jnp.float32)  # (TQ, E)

        # fc_out bias; Dropout(p=0.0) is the identity.
        o_ref[...] = acc + bo_ref[...]

    return mha_kernel


def multi_head_attention(x, wq, wk, wv, wo, bo, heads, head_dim):
    """x: (B, L, E); wq/wk/wv: (E, H*D); wo: (H*D, E); bo: (1, E).  Returns (B, L, E) f32."""
    B, L, E = x.shape
    H, D = heads, head_dim
    HD = H * D

    # Query-block tiling: one block for short sequences, 128-row blocks otherwise.
    TQ = L if L <= 128 else 128
    assert L % TQ == 0, "sequence length must tile evenly into query blocks"
    NQ = L // TQ

    scale = 1.0 / math.sqrt(E)  # PyTorch code divides by embed_size ** 0.5 (kept as-is)

    # Fuse + cast parameters once in the wrapper (halves HBM traffic, 1 weight DMA).
    wqkv = jnp.concatenate([wq, wk, wv], axis=1).astype(jnp.bfloat16)  # (E, 3*HD)
    wo_bf = wo.astype(jnp.bfloat16)
    bo_f32 = bo.astype(jnp.float32)
    x_bf = x.astype(jnp.bfloat16)

    kernel = make_mha_kernel(L, E, H, D, TQ, NQ, scale)

    return pl.pallas_call(
        kernel,
        out_shape=jax.ShapeDtypeStruct((B, L, E), jnp.float32),
        grid_spec=pltpu.PrefetchScalarGridSpec(
            num_scalar_prefetch=0,
            grid=(B, NQ),
            in_specs=[
                # Full sequence per batch element; leading batch dim squeezed away.
                pl.BlockSpec((None, L, E), lambda b, q: (b, 0, 0)),   # x (bf16)
                pl.BlockSpec((E, 3 * HD), lambda b, q: (0, 0)),       # fused Wqkv
                pl.BlockSpec((HD, E), lambda b, q: (0, 0)),           # Wo
                pl.BlockSpec((1, E), lambda b, q: (0, 0)),            # fc_out bias
            ],
            out_specs=pl.BlockSpec((None, TQ, E), lambda b, q: (b, q, 0)),
        ),
        compiler_params=pltpu.CompilerParams(
            dimension_semantics=("parallel", "parallel"),
            vmem_limit_bytes=64 * 1024 * 1024,  # explicit cap; tiny usage, v7x-safe
        ),
    )(x_bf, wqkv, wo_bf, bo_f32)


def mha_reference(x, wq, wk, wv, wo, bo, heads, head_dim):
    """Pure-JAX f32 reference matching the PyTorch forward exactly."""
    B, L, E = x.shape
    H, D = heads, head_dim
    q = (x @ wq).reshape(B, L, H, D)
    k = (x @ wk).reshape(B, L, H, D)
    v = (x @ wv).reshape(B, L, H, D)
    energy = jnp.einsum('nqhd,nkhd->nhqk', q, k)
    attn = jax.nn.softmax(energy / math.sqrt(E), axis=3)
    out = jnp.einsum('nhql,nlhd->nqhd', attn, v).reshape(B, L, H * D)
    return out @ wo + bo


if __name__ == "__main__":
    # Small shapes consistent with the module: embed_size=32, heads=4, head_dim=8
    B, L, E = 2, 8, 32
    H = 4
    D = E // H  # 8
    HD = H * D

    key = jax.random.PRNGKey(0)
    kx, kq, kk, kv, ko, kb = jax.random.split(key, 6)

    x = jax.random.normal(kx, (B, L, E), dtype=jnp.float32)

    # Parameters generated directly in (in, out) layout so the kernel computes x @ W
    # (equivalent to PyTorch's x @ W.T with W stored as (out, in)).
    init_scale = 1.0 / math.sqrt(E)
    wq = jax.random.uniform(kq, (E, HD), jnp.float32, -init_scale, init_scale)
    wk = jax.random.uniform(kk, (E, HD), jnp.float32, -init_scale, init_scale)
    wv = jax.random.uniform(kv, (E, HD), jnp.float32, -init_scale, init_scale)
    wo = jax.random.uniform(ko, (HD, E), jnp.float32, -init_scale, init_scale)
    bo = jax.random.uniform(kb, (1, E), jnp.float32, -init_scale, init_scale)

    out = multi_head_attention(x, wq, wk, wv, wo, bo, heads=H, head_dim=D)
    out = jax.block_until_ready(out)

    ref = mha_reference(x, wq, wk, wv, wo, bo, heads=H, head_dim=D)
    assert out.shape == (B, L, E)
    # bf16 MXU operands (f32 accumulation) + approximate reciprocal -> looser tolerance
    # than the pure-f32 reference.
    assert jnp.allclose(out, ref, atol=5e-2, rtol=5e-2), "mismatch vs reference"

    # TODO(synk): optional `mask` argument (masked_fill with -1e20) not implemented;
    # dropout(p=0.0) is an identity so it is omitted.
    print("KERNEL_OK")
</pallas_src>

<mosaic_0001>
module attributes {stable_mosaic.version = 11 : i64} {
  func.func @mha_kernel(%arg0: i32, %arg1: i32, %arg2: memref<1x8x32xbf16, #tpu.memory_space<vmem>>, %arg3: memref<32x96xbf16, #tpu.memory_space<vmem>>, %arg4: memref<32x32xbf16, #tpu.memory_space<vmem>>, %arg5: memref<1x32xf32, #tpu.memory_space<vmem>>, %arg6: memref<1x8x32xf32, #tpu.memory_space<vmem>>) attributes {dimension_semantics = [#tpu.dimension_semantics<parallel>, #tpu.dimension_semantics<parallel>], iteration_bounds = array<i64: 2, 1>, scalar_prefetch = 0 : i64, scratch_operands = 0 : i64, tpu.core_type = #tpu.core_type<tc>, window_params = [{transform_indices = @transform_0, window_bounds = array<i64: 1, 8, 32>}, {pipeline_mode = #tpu.pipeline_mode<synchronous>, transform_indices = @transform_1, window_bounds = array<i64: 32, 96>}, {pipeline_mode = #tpu.pipeline_mode<synchronous>, transform_indices = @transform_2, window_bounds = array<i64: 32, 32>}, {pipeline_mode = #tpu.pipeline_mode<synchronous>, transform_indices = @transform_3, window_bounds = array<i64: 1, 32>}, {transform_indices = @transform_4, window_bounds = array<i64: 1, 8, 32>}]} {
    %c0 = arith.constant 0 : index
    %c0_0 = arith.constant 0 : index
    %c0_1 = arith.constant 0 : index
    %0 = vector.load %arg2[%c0, %c0_0, %c0_1] : memref<1x8x32xbf16, #tpu.memory_space<vmem>>, vector<1x8x32xbf16>
    %1 = vector.shape_cast %0 : vector<1x8x32xbf16> to vector<8x32xbf16>
    %c0_2 = arith.constant 0 : index
    %c0_3 = arith.constant 0 : index
    %2 = vector.load %arg3[%c0_2, %c0_3] : memref<32x96xbf16, #tpu.memory_space<vmem>>, vector<32x96xbf16>
    %cst = arith.constant dense<0.000000e+00> : vector<8x96xf32>
    %3 = tpu.matmul %1, %2, %cst {dimension_numbers = #tpu.dot_dimension_numbers<[1], [0], [0], [1], [0, 0, 1, 1], [], []>} : vector<8x32xbf16>, vector<32x96xbf16>, vector<8x96xf32> -> vector<8x96xf32>
    %4 = arith.truncf %3 : vector<8x96xf32> to vector<8x96xbf16>
    %5 = vector.extract_strided_slice %4 {offsets = [0, 0], sizes = [8, 32], strides = [1, 1]} : vector<8x96xbf16> to vector<8x32xbf16>
    %6 = vector.extract_strided_slice %4 {offsets = [0, 32], sizes = [8, 32], strides = [1, 1]} : vector<8x96xbf16> to vector<8x32xbf16>
    %7 = vector.extract_strided_slice %4 {offsets = [0, 64], sizes = [8, 32], strides = [1, 1]} : vector<8x96xbf16> to vector<8x32xbf16>
    %cst_4 = arith.constant 0.000000e+00 : f32
    %8 = vector.broadcast %cst_4 : f32 to vector<8x32xf32>
    %9 = vector.extract_strided_slice %5 {offsets = [0, 0], sizes = [8, 8], strides = [1, 1]} : vector<8x32xbf16> to vector<8x8xbf16>
    %10 = vector.extract_strided_slice %6 {offsets = [0, 0], sizes = [8, 8], strides = [1, 1]} : vector<8x32xbf16> to vector<8x8xbf16>
    %11 = vector.extract_strided_slice %7 {offsets = [0, 0], sizes = [8, 8], strides = [1, 1]} : vector<8x32xbf16> to vector<8x8xbf16>
    %cst_5 = arith.constant dense<0.000000e+00> : vector<8x8xf32>
    %12 = tpu.matmul %9, %10, %cst_5 {dimension_numbers = #tpu.dot_dimension_numbers<[1], [1], [0], [0], [0, 0, 1, 0], [], []>} : vector<8x8xbf16>, vector<8x8xbf16>, vector<8x8xf32> -> vector<8x8xf32>
    %cst_6 = arith.constant 0.176776692 : f32
    %13 = vector.broadcast %cst_6 : f32 to vector<8x8xf32>
    %14 = arith.mulf %12, %13 : vector<8x8xf32>
    %cst_7 = arith.constant dense<0xFF800000> : vector<8xf32>
    %15 = vector.multi_reduction <maximumf>, %14, %cst_7 [1] : vector<8x8xf32> to vector<8xf32>
    %16 = vector.shape_cast %15 : vector<8xf32> to vector<8x1xf32>
    %17 = vector.broadcast %16 : vector<8x1xf32> to vector<8x8xf32>
    %18 = arith.subf %14, %17 : vector<8x8xf32>
    %19 = math.exp %18 : vector<8x8xf32>
    %cst_8 = arith.constant dense<0.000000e+00> : vector<8xf32>
    %20 = vector.multi_reduction <add>, %19, %cst_8 [1] : vector<8x8xf32> to vector<8xf32>
    %21 = vector.shape_cast %20 : vector<8xf32> to vector<8x1xf32>
    %22 = tpu.reciprocal %21 {approx = true} : vector<8x1xf32> -> vector<8x1xf32>
    %23 = vector.broadcast %22 : vector<8x1xf32> to vector<8x8xf32>
    %24 = arith.mulf %19, %23 : vector<8x8xf32>
    %25 = arith.truncf %24 : vector<8x8xf32> to vector<8x8xbf16>
    %cst_9 = arith.constant dense<0.000000e+00> : vector<8x8xf32>
    %26 = tpu.matmul %25, %11, %cst_9 {dimension_numbers = #tpu.dot_dimension_numbers<[1], [0], [0], [1], [0, 0, 1, 1], [], []>} : vector<8x8xbf16>, vector<8x8xbf16>, vector<8x8xf32> -> vector<8x8xf32>
    %27 = arith.truncf %26 : vector<8x8xf32> to vector<8x8xbf16>
    %c0_10 = arith.constant 0 : index
    %c0_11 = arith.constant 0 : index
    %28 = vector.load %arg4[%c0_10, %c0_11] : memref<32x32xbf16, #tpu.memory_space<vmem>>, vector<8x32xbf16>
    %cst_12 = arith.constant dense<0.000000e+00> : vector<8x32xf32>
    %29 = tpu.matmul %27, %28, %cst_12 {dimension_numbers = #tpu.dot_dimension_numbers<[1], [0], [0], [1], [0, 0, 1, 1], [], []>} : vector<8x8xbf16>, vector<8x32xbf16>, vector<8x32xf32> -> vector<8x32xf32>
    %30 = arith.addf %8, %29 : vector<8x32xf32>
    %31 = vector.extract_strided_slice %5 {offsets = [0, 8], sizes = [8, 8], strides = [1, 1]} : vector<8x32xbf16> to vector<8x8xbf16>
    %32 = vector.extract_strided_slice %6 {offsets = [0, 8], sizes = [8, 8], strides = [1, 1]} : vector<8x32xbf16> to vector<8x8xbf16>
    %33 = vector.extract_strided_slice %7 {offsets = [0, 8], sizes = [8, 8], strides = [1, 1]} : vector<8x32xbf16> to vector<8x8xbf16>
    %cst_13 = arith.constant dense<0.000000e+00> : vector<8x8xf32>
    %34 = tpu.matmul %31, %32, %cst_13 {dimension_numbers = #tpu.dot_dimension_numbers<[1], [1], [0], [0], [0, 0, 1, 0], [], []>} : vector<8x8xbf16>, vector<8x8xbf16>, vector<8x8xf32> -> vector<8x8xf32>
    %cst_14 = arith.constant 0.176776692 : f32
    %35 = vector.broadcast %cst_14 : f32 to vector<8x8xf32>
    %36 = arith.mulf %34, %35 : vector<8x8xf32>
    %cst_15 = arith.constant dense<0xFF800000> : vector<8xf32>
    %37 = vector.multi_reduction <maximumf>, %36, %cst_15 [1] : vector<8x8xf32> to vector<8xf32>
    %38 = vector.shape_cast %37 : vector<8xf32> to vector<8x1xf32>
    %39 = vector.broadcast %38 : vector<8x1xf32> to vector<8x8xf32>
    %40 = arith.subf %36, %39 : vector<8x8xf32>
    %41 = math.exp %40 : vector<8x8xf32>
    %cst_16 = arith.constant dense<0.000000e+00> : vector<8xf32>
    %42 = vector.multi_reduction <add>, %41, %cst_16 [1] : vector<8x8xf32> to vector<8xf32>
    %43 = vector.shape_cast %42 : vector<8xf32> to vector<8x1xf32>
    %44 = tpu.reciprocal %43 {approx = true} : vector<8x1xf32> -> vector<8x1xf32>
    %45 = vector.broadcast %44 : vector<8x1xf32> to vector<8x8xf32>
    %46 = arith.mulf %41, %45 : vector<8x8xf32>
    %47 = arith.truncf %46 : vector<8x8xf32> to vector<8x8xbf16>
    %cst_17 = arith.constant dense<0.000000e+00> : vector<8x8xf32>
    %48 = tpu.matmul %47, %33, %cst_17 {dimension_numbers = #tpu.dot_dimension_numbers<[1], [0], [0], [1], [0, 0, 1, 1], [], []>} : vector<8x8xbf16>, vector<8x8xbf16>, vector<8x8xf32> -> vector<8x8xf32>
    %49 = arith.truncf %48 : vector<8x8xf32> to vector<8x8xbf16>
    %c8 = arith.constant 8 : index
    %c0_18 = arith.constant 0 : index
    %50 = vector.load %arg4[%c8, %c0_18] : memref<32x32xbf16, #tpu.memory_space<vmem>>, vector<8x32xbf16>
    %cst_19 = arith.constant dense<0.000000e+00> : vector<8x32xf32>
    %51 = tpu.matmul %49, %50, %cst_19 {dimension_numbers = #tpu.dot_dimension_numbers<[1], [0], [0], [1], [0, 0, 1, 1], [], []>} : vector<8x8xbf16>, vector<8x32xbf16>, vector<8x32xf32> -> vector<8x32xf32>
    %52 = arith.addf %30, %51 : vector<8x32xf32>
    %53 = vector.extract_strided_slice %5 {offsets = [0, 16], sizes = [8, 8], strides = [1, 1]} : vector<8x32xbf16> to vector<8x8xbf16>
    %54 = vector.extract_strided_slice %6 {offsets = [0, 16], sizes = [8, 8], strides = [1, 1]} : vector<8x32xbf16> to vector<8x8xbf16>
    %55 = vector.extract_strided_slice %7 {offsets = [0, 16], sizes = [8, 8], strides = [1, 1]} : vector<8x32xbf16> to vector<8x8xbf16>
    %cst_20 = arith.constant dense<0.000000e+00> : vector<8x8xf32>
    %56 = tpu.matmul %53, %54, %cst_20 {dimension_numbers = #tpu.dot_dimension_numbers<[1], [1], [0], [0], [0, 0, 1, 0], [], []>} : vector<8x8xbf16>, vector<8x8xbf16>, vector<8x8xf32> -> vector<8x8xf32>
    %cst_21 = arith.constant 0.176776692 : f32
    %57 = vector.broadcast %cst_21 : f32 to vector<8x8xf32>
    %58 = arith.mulf %56, %57 : vector<8x8xf32>
    %cst_22 = arith.constant dense<0xFF800000> : vector<8xf32>
    %59 = vector.multi_reduction <maximumf>, %58, %cst_22 [1] : vector<8x8xf32> to vector<8xf32>
    %60 = vector.shape_cast %59 : vector<8xf32> to vector<8x1xf32>
    %61 = vector.broadcast %60 : vector<8x1xf32> to vector<8x8xf32>
    %62 = arith.subf %58, %61 : vector<8x8xf32>
    %63 = math.exp %62 : vector<8x8xf32>
    %cst_23 = arith.constant dense<0.000000e+00> : vector<8xf32>
    %64 = vector.multi_reduction <add>, %63, %cst_23 [1] : vector<8x8xf32> to vector<8xf32>
    %65 = vector.shape_cast %64 : vector<8xf32> to vector<8x1xf32>
    %66 = tpu.reciprocal %65 {approx = true} : vector<8x1xf32> -> vector<8x1xf32>
    %67 = vector.broadcast %66 : vector<8x1xf32> to vector<8x8xf32>
    %68 = arith.mulf %63, %67 : vector<8x8xf32>
    %69 = arith.truncf %68 : vector<8x8xf32> to vector<8x8xbf16>
    %cst_24 = arith.constant dense<0.000000e+00> : vector<8x8xf32>
    %70 = tpu.matmul %69, %55, %cst_24 {dimension_numbers = #tpu.dot_dimension_numbers<[1], [0], [0], [1], [0, 0, 1, 1], [], []>} : vector<8x8xbf16>, vector<8x8xbf16>, vector<8x8xf32> -> vector<8x8xf32>
    %71 = arith.truncf %70 : vector<8x8xf32> to vector<8x8xbf16>
    %c16 = arith.constant 16 : index
    %c0_25 = arith.constant 0 : index
    %72 = vector.load %arg4[%c16, %c0_25] : memref<32x32xbf16, #tpu.memory_space<vmem>>, vector<8x32xbf16>
    %cst_26 = arith.constant dense<0.000000e+00> : vector<8x32xf32>
    %73 = tpu.matmul %71, %72, %cst_26 {dimension_numbers = #tpu.dot_dimension_numbers<[1], [0], [0], [1], [0, 0, 1, 1], [], []>} : vector<8x8xbf16>, vector<8x32xbf16>, vector<8x32xf32> -> vector<8x32xf32>
    %74 = arith.addf %52, %73 : vector<8x32xf32>
    %75 = vector.extract_strided_slice %5 {offsets = [0, 24], sizes = [8, 8], strides = [1, 1]} : vector<8x32xbf16> to vector<8x8xbf16>
    %76 = vector.extract_strided_slice %6 {offsets = [0, 24], sizes = [8, 8], strides = [1, 1]} : vector<8x32xbf16> to vector<8x8xbf16>
    %77 = vector.extract_strided_slice %7 {offsets = [0, 24], sizes = [8, 8], strides = [1, 1]} : vector<8x32xbf16> to vector<8x8xbf16>
    %cst_27 = arith.constant dense<0.000000e+00> : vector<8x8xf32>
    %78 = tpu.matmul %75, %76, %cst_27 {dimension_numbers = #tpu.dot_dimension_numbers<[1], [1], [0], [0], [0, 0, 1, 0], [], []>} : vector<8x8xbf16>, vector<8x8xbf16>, vector<8x8xf32> -> vector<8x8xf32>
    %cst_28 = arith.constant 0.176776692 : f32
    %79 = vector.broadcast %cst_28 : f32 to vector<8x8xf32>
    %80 = arith.mulf %78, %79 : vector<8x8xf32>
    %cst_29 = arith.constant dense<0xFF800000> : vector<8xf32>
    %81 = vector.multi_reduction <maximumf>, %80, %cst_29 [1] : vector<8x8xf32> to vector<8xf32>
    %82 = vector.shape_cast %81 : vector<8xf32> to vector<8x1xf32>
    %83 = vector.broadcast %82 : vector<8x1xf32> to vector<8x8xf32>
    %84 = arith.subf %80, %83 : vector<8x8xf32>
    %85 = math.exp %84 : vector<8x8xf32>
    %cst_30 = arith.constant dense<0.000000e+00> : vector<8xf32>
    %86 = vector.multi_reduction <add>, %85, %cst_30 [1] : vector<8x8xf32> to vector<8xf32>
    %87 = vector.shape_cast %86 : vector<8xf32> to vector<8x1xf32>
    %88 = tpu.reciprocal %87 {approx = true} : vector<8x1xf32> -> vector<8x1xf32>
    %89 = vector.broadcast %88 : vector<8x1xf32> to vector<8x8xf32>
    %90 = arith.mulf %85, %89 : vector<8x8xf32>
    %91 = arith.truncf %90 : vector<8x8xf32> to vector<8x8xbf16>
    %cst_31 = arith.constant dense<0.000000e+00> : vector<8x8xf32>
    %92 = tpu.matmul %91, %77, %cst_31 {dimension_numbers = #tpu.dot_dimension_numbers<[1], [0], [0], [1], [0, 0, 1, 1], [], []>} : vector<8x8xbf16>, vector<8x8xbf16>, vector<8x8xf32> -> vector<8x8xf32>
    %93 = arith.truncf %92 : vector<8x8xf32> to vector<8x8xbf16>
    %c24 = arith.constant 24 : index
    %c0_32 = arith.constant 0 : index
    %94 = vector.load %arg4[%c24, %c0_32] : memref<32x32xbf16, #tpu.memory_space<vmem>>, vector<8x32xbf16>
    %cst_33 = arith.constant dense<0.000000e+00> : vector<8x32xf32>
    %95 = tpu.matmul %93, %94, %cst_33 {dimension_numbers = #tpu.dot_dimension_numbers<[1], [0], [0], [1], [0, 0, 1, 1], [], []>} : vector<8x8xbf16>, vector<8x32xbf16>, vector<8x32xf32> -> vector<8x32xf32>
    %96 = arith.addf %74, %95 : vector<8x32xf32>
    %c0_34 = arith.constant 0 : index
    %c0_35 = arith.constant 0 : index
    %97 = vector.load %arg5[%c0_34, %c0_35] : memref<1x32xf32, #tpu.memory_space<vmem>>, vector<1x32xf32>
    %98 = vector.broadcast %97 : vector<1x32xf32> to vector<8x32xf32>
    %99 = arith.addf %96, %98 : vector<8x32xf32>
    %c0_36 = arith.constant 0 : index
    %c0_37 = arith.constant 0 : index
    %c0_38 = arith.constant 0 : index
    %100 = vector.load %arg6[%c0_36, %c0_37, %c0_38] : memref<1x8x32xf32, #tpu.memory_space<vmem>>, vector<1x8x32xf32>
    %101 = vector.shape_cast %100 : vector<1x8x32xf32> to vector<8x32xf32>
    %102 = vector.shape_cast %99 : vector<8x32xf32> to vector<1x8x32xf32>
    tpu.vector_store %arg6[%c0_36, %c0_37, %c0_38], %102 {strides = array<i32>} : memref<1x8x32xf32, #tpu.memory_space<vmem>>, vector<1x8x32xf32>,
    return
  }
  func.func @transform_0(%arg0: i32, %arg1: i32) -> (i32, i32, i32) {
    %c0_i32 = arith.constant 0 : i32
    %c0_i32_0 = arith.constant 0 : i32
    %c0_i32_1 = arith.constant 0 : i32
    return %arg0, %c0_i32, %c0_i32_0 : i32, i32, i32
  }
  func.func @transform_1(%arg0: i32, %arg1: i32) -> (i32, i32) {
    %c0_i32 = arith.constant 0 : i32
    %c0_i32_0 = arith.constant 0 : i32
    %c0_i32_1 = arith.constant 0 : i32
    return %c0_i32, %c0_i32_0 : i32, i32
  }
  func.func @transform_2(%arg0: i32, %arg1: i32) -> (i32, i32) {
    %c0_i32 = arith.constant 0 : i32
    %c0_i32_0 = arith.constant 0 : i32
    %c0_i32_1 = arith.constant 0 : i32
    return %c0_i32, %c0_i32_0 : i32, i32
  }
  func.func @transform_3(%arg0: i32, %arg1: i32) -> (i32, i32) {
    %c0_i32 = arith.constant 0 : i32
    %c0_i32_0 = arith.constant 0 : i32
    %c0_i32_1 = arith.constant 0 : i32
    return %c0_i32, %c0_i32_0 : i32, i32
  }
  func.func @transform_4(%arg0: i32, %arg1: i32) -> (i32, i32, i32) {
    %c0_i32 = arith.constant 0 : i32
    %c0_i32_0 = arith.constant 0 : i32
    return %arg0, %arg1, %c0_i32 : i32, i32, i32
  }
}

</mosaic_0001>

<bundles_post_ra>
// kernel: tpu_custom_call.1
= control target key start
LH: loop header
LB: loop body
LE: loop exit
PB: predicated region body
PF: predicated region fallthrough
CT: control target
= control target key end

     0   :  { %9 = vsyncpa [#allocation3], 0  ;;  %s1989_s0 = inlined_call_operand.hbm [shape: bf16[2,8,32], index: 0, kind: input, shape index: {}]   ;;  %s1990_s1 = inlined_call_operand.hbm [shape: bf16[32,96], index: 1, kind: input, shape index: {}]   ;;  %s1991_s2 = inlined_call_operand.hbm [shape: bf16[32,32], index: 2, kind: input, shape index: {}]   ;;  %s1992_s3 = inlined_call_operand.hbm [shape: f32[1,32], index: 3, kind: input, shape index: {}]   ;;  %s1993_s4 = inlined_call_operand.hbm [shape: f32[2,8,32], index: 4, kind: output, shape index: {}]  }
   0x1   :  { %11 = vsyncpa [#allocation3 + $0x1], 0 }
   0x2   :  { %12 = vsyncpa [#allocation6], 0 }
   0x3   :  { %13 = vsyncpa [#allocation9], 0 }
   0x4   :  { %14 = vsyncpa [#allocation4], 0 }
   0x5   :  { %16 = vsyncpa [#allocation4 + $0x1], 0  ;;  %s1622_s15 = smov 0   ;;  %s1624_s16 = smov 0  }
   0x6   :  { %s1626_s17 = smov 0   ;;  %s1628_s18 = smov 0  }
   0x7   :  { %s1630_s19 = smov 0   ;;  %s1632_s20 = smov 0  }
   0x8 LB: > { %s1103_s21 = sadd.s32 4294967295, %s1575_s20   ;;  %s1104_s22 = sadd.s32 4294967294, %s1575_s20   ;;  %s1575_s20 = sphi %s1632_s20, %s22_s20   ;;  %s1571_s19 = sphi %s1630_s19, %s2020_s19   ;;  %s1567_s18 = sphi %s1628_s18, %s2019_s18   ;;  %s1563_s17 = sphi %s1626_s17, %s2018_s17   ;;  %s1559_s16 = sphi %s1624_s16, %s2017_s16   ;;  %s1555_s15 = sphi %s1622_s15, %s2016_s15  }
   0x9   : > { %p54_p0 = scmp.ne.s32.totalorder %s1559_s16, %s1555_s15  ;;  %p1656_p1 = scmp.eq.s32.totalorder %s1103_s21, 0 }
   0xa   : > { %p1660_p2 = scmp.eq.s32.totalorder %s1103_s21, 1  ;;  %p149_p3 = scmp.eq.s32.totalorder %s1104_s22, 1 }
   0xb   : > { %s1999_s23 = scalar_select %p1656_p1, 1, 0 }
   0xc   : > { %s2000_s24 = scalar_select %p1660_p2, 1, 0 }
   0xd   : > { %p1666_p4 = por %p1656_p1, %p54_p0  ;;  %p1105_p5 = scmp.ge.s32.totalorder %s1575_s20, 1 }
   0xe   : > { %p1671_p6 = por %p149_p3, %p54_p0  ;;  %p156_p7 = scmp.lt.s32.totalorder %s1575_s20, 3 }
   0xf   : > { %s2001_s25 = scalar_select %p1666_p4, 1, 0 }
  0x10   : > { %s2002_s26 = scalar_select %p1671_p6, 1, 0 }
  0x11   : > { %p1676_p8 = pnand %p1105_p5, %p156_p7  ;;  %s1577_s28 = smov [#allocation5]  }
  0x12   : > { %2003 = sst [smem:[#allocation15_spill]] %s2002_s26  ;;  %s168_s29 = sshll.u32 %s1577_s28, 4  ;;  %s1680_s29 = int_to_ptr.vmem [resolvable:$true] %s168_s29 }
  0x13   : > { %s2004_s27 = scalar_select %p1676_p8, 1, 0 }
  0x14   : > { %p1261_p9 = pneg %p1676_p8  ;;  %s1578_s5 = smov [#allocation7]  }
  0x15   : > { %s181_s6 = sshll.u32 %s1578_s5, 4  ;;  %s1579_s7 = smov [#allocation8]   ;;  %s1691_s6 = int_to_ptr.vmem [resolvable:$true] %s181_s6 }
  0x16   : > { %p1687_p11 = pnand %p1261_p9, %p1656_p1  ;;  %s1693_s8 = sshll.u32 %s1579_s7, 4  ;;  %s196_s8 = int_to_ptr.vmem [resolvable:$true] %s1693_s8 }
  0x17   : > { %s1371_s11 = scalar_lea.hbm %s1990_s1, 256 }
  0x18   : > { %p1372_p12 = scmp.ne.s32.totalorder %s1990_s1, %s1371_s11  ;;  %p1703_p13 = pneg %p1687_p11 }
  0x19   : > { %p1378_p5 = scmp.lt.u32.totalorder %s1371_s11, %s1990_s1 }
  0x1a   : > { %p1374_p0 = pnand %p1703_p13, %p1372_p12 }
  0x1c   : > { %p1375_p3 = pneg %p1374_p0 }
  0x1e   : > { %p1380_p7 = pnand %p1378_p5, %p1375_p3 }
  0x20   : > { %1383 = shalt.err (!%p1380_p7)
}
  0x21   : > { %s1384_s28 = scalar_lea.vmem %s1680_s29, 256  ;;  %p1392_p1 = scmp.lt.s32.totalorder %s1680_s29, %s1680_s29 }
  0x22   : > { %p1385_p9 = scmp.ne.s32.totalorder %s1680_s29, %s1384_s28  ;;  %p1393_p4 = scmp.lt.s32.totalorder %s1384_s28, %s1384_s28 }
  0x24   : > { %p1387_p10 = pnand %p1385_p9, %p1703_p13  ;;  %p1394_p12 = por %p1393_p4, %p1392_p1 }
  0x26   : > { %p1388_p6 = pneg %p1387_p10 }
  0x28   : > { %p1395_p0 = pnand %p1394_p12, %p1388_p6 }
  0x2a   : > { %1398 = shalt.err (!%p1395_p0)
}
  0x2b   : > { %s1580_s5 = smov 64   ;;  %s1581_s7 = smov 4  }
  0x2c   : > { %1264 = dma.hbm_to_vmem [thread:$0]  (!%p1687_p11), %s1990_s1, 256, %s1680_s29, [#allocation6], %s1580_s5, %s1580_s5, %s1581_s7  }
  0x2d   : > { %s1399_s13 = scalar_lea.hbm %s1991_s2, 256 }
  0x2e   : > { %p1400_p1 = scmp.ne.s32.totalorder %s1991_s2, %s1399_s13  ;;  %p1406_p10 = scmp.lt.u32.totalorder %s1399_s13, %s1991_s2 }
  0x30   : > { %p1402_p4 = pnand %p1400_p1, %p1703_p13 }
  0x32   : > { %p1403_p6 = pneg %p1402_p4 }
  0x34   : > { %p1408_p3 = pnand %p1406_p10, %p1403_p6 }
  0x36   : > { %1411 = shalt.err (!%p1408_p3)
}
  0x37   : > { %s1412_s29 = scalar_lea.vmem %s1691_s6, 256  ;;  %p1420_p12 = scmp.lt.s32.totalorder %s1691_s6, %s1691_s6 }
  0x38   : > { %p1413_p5 = scmp.ne.s32.totalorder %s1691_s6, %s1412_s29  ;;  %p1421_p0 = scmp.lt.s32.totalorder %s1412_s29, %s1412_s29 }
  0x3a   : > { %p1415_p7 = pnand %p1413_p5, %p1703_p13  ;;  %p1422_p1 = por %p1421_p0, %p1420_p12 }
  0x3c   : > { %p1416_p9 = pneg %p1415_p7 }
  0x3e   : > { %p1423_p4 = pnand %p1422_p1, %p1416_p9 }
  0x40   : > { %1426 = shalt.err (!%p1423_p4)
}
  0x41   : > { %1267 = dma.hbm_to_vmem [thread:$0]  (!%p1687_p11), %s1991_s2, 256, %s1691_s6, [#allocation6], %s1580_s5, %s1580_s5, %s1581_s7  }
  0x42   : > { %s1427_s12 = scalar_lea.hbm %s1992_s3, 16 }
  0x43   : > { %p1428_p6 = scmp.ne.s32.totalorder %s1992_s3, %s1427_s12  ;;  %p1434_p5 = scmp.lt.u32.totalorder %s1427_s12, %s1992_s3 }
  0x45   : > { %p1430_p10 = pnand %p1428_p6, %p1703_p13 }
  0x47   : > { %p1431_p3 = pneg %p1430_p10 }
  0x49   : > { %p1436_p7 = pnand %p1434_p5, %p1431_p3 }
  0x4b   : > { %1439 = shalt.err (!%p1436_p7)
}
  0x4c   : > { %s1440_s29 = scalar_lea.vmem %s196_s8, 16  ;;  %s1447_s6 = scalar_lea.vmem %s196_s8, 32 }
  0x4d   : > { %p1441_p9 = scmp.ne.s32.totalorder %s196_s8, %s1440_s29  ;;  %p1448_p1 = scmp.lt.s32.totalorder %s196_s8, %s196_s8 }
  0x4e   : > { %p1449_p4 = scmp.lt.s32.totalorder %s1447_s6, %s1440_s29 }
  0x4f   : > { %p1443_p12 = pnand %p1441_p9, %p1703_p13 }
  0x50   : > { %p1450_p8 = por %p1449_p4, %p1448_p1 }
  0x51   : > { %p1444_p0 = pneg %p1443_p12 }
  0x53   : > { %p1451_p2 = pnand %p1450_p8, %p1444_p0 }
  0x55   : > { %1454 = shalt.err (!%p1451_p2)
}
  0x56   : > { %1270 = dma.hbm_to_vmem [thread:$0]  (!%p1687_p11), %s1992_s3, 16, %s196_s8, [#allocation9]  }
  0x57   : > { %s41_s14 = sadd.s32 1, %s1563_s17  ;;  %s34_s26 = sadd.s32 1, %s1571_s19 }
  0x58   : > { %p48_p2 = scmp.ne.s32.totalorder %s1563_s17, %s1559_s16  ;;  %p36_p8 = scmp.ge.s32.totalorder %s34_s26, 2 }
  0x59   : > { %p49_p13 = scmp.eq.s32.totalorder %s1575_s20, 0  ;;  %p2007_p6 = scmp.ne.s32.totalorder %s2000_s24, 0 }
  0x5a   : > { %p1282_p3 = scmp.lt.s32.totalorder %s1575_s20, 2  ;;  %s2022_s26 = smov (%p36_p8, %s34_s26), 0 }
  0x5b   : > { %p1773_p10 = por %p2007_p6, %p48_p2  ;;  %p50_p5 = por %p49_p13, %p48_p2 }
  0x5c   : > { %s206_s9 = sand.u32 1, %s1563_s17   ;;  %s38_s10 = ssub.s32 %s1571_s19, %s2022_s26 }
  0x5d   : > { %p39_p7 = scmp.eq.s32.totalorder %s38_s10, 0  ;;  %s1110_s8 = sshll.u32 %s206_s9, 2 }
  0x5e   : > { %s1111_s11 = sshll.u32 %s1571_s19, 6  ;;  %s210_s22 = scalar_lea.vmem [#allocation2], %s1110_s8 }
  0x5f   : > { %s1785_s12 = scalar_select %p39_p7, %s1563_s17, %s41_s14  }
  0x60   : > { %s1790_s24 = scalar_lea.hbm %s1989_s0, %s1111_s11  ;;  %s217_s28 = sshll.u32 %s210_s22, 4  ;;  %s1792_s28 = int_to_ptr.vmem [resolvable:$true] %s217_s28 }
  0x61   : > { %p1796_p11 = pnand %p1282_p3, %p50_p5  ;;  %s207_s6 = scalar_lea.sflag [#allocation3], %s206_s9 }
  0x62   : > { %s1455_s5 = scalar_lea.hbm %s1790_s24, 64  ;;  %s1460_s10 = scalar_lea.hbm %s1989_s0, 128 }
  0x63   : > { %p1456_p9 = scmp.ne.s32.totalorder %s1790_s24, %s1455_s5  ;;  %p1457_p12 = pneg %p1796_p11 }
  0x64   : > { %p1461_p4 = scmp.lt.u32.totalorder %s1790_s24, %s1989_s0  ;;  %p1462_p2 = scmp.lt.u32.totalorder %s1460_s10, %s1455_s5 }
  0x65   : > { %p1458_p0 = pnand %p1457_p12, %p1456_p9  ;;  %p1464_p13 = scmp.lt.u32.totalorder %s1455_s5, %s1790_s24 }
  0x66   : > { %p1463_p8 = por %p1462_p2, %p1461_p4 }
  0x67   : > { %p1459_p1 = pneg %p1458_p0 }
  0x68   : > { %p1465_p6 = por %p1464_p13, %p1463_p8 }
  0x6a   : > { %p1466_p3 = pnand %p1465_p6, %p1459_p1 }
  0x6c   : > { %1469 = shalt.err (!%p1466_p3)
}
  0x6d   : > { %s1470_s9 = scalar_lea.vmem %s1792_s28, 64  ;;  %s1582_s13 = smov [#allocation2]  }
  0x6e   : > { %p1471_p5 = scmp.ne.s32.totalorder %s1792_s28, %s1470_s9  ;;  %s1475_s21 = sshll.u32 %s1582_s13, 4  ;;  %s1476_s21 = int_to_ptr.vmem [resolvable:$false] %s1475_s21 }
  0x6f   : > { %s1477_s22 = scalar_lea.vmem %s1476_s21, 128  ;;  %p1478_p0 = scmp.lt.s32.totalorder %s1792_s28, %s1476_s21 }
  0x70   : > { %p1473_p7 = pnand %p1471_p5, %p1457_p12  ;;  %p1479_p4 = scmp.lt.s32.totalorder %s1477_s22, %s1470_s9 }
  0x72   : > { %p1474_p9 = pneg %p1473_p7  ;;  %p1480_p2 = por %p1479_p4, %p1478_p0 }
  0x74   : > { %p1481_p8 = pnand %p1480_p2, %p1474_p9 }
  0x76   : > { %1484 = shalt.err (!%p1481_p8)
}
  0x77   : > { %1274 = dma.hbm_to_vmem [thread:$0]  (!%p1796_p11), %s1790_s24, 64, %s1792_s28, %s207_s6  }
  0x78   : > { %p2010_p1 = scmp.ne.s32.totalorder %s2004_s27, 0 }
  0x79   : > { %s1828_s5 = sand.u32 (!%p2010_p1), 1, %s1559_s16   ;;  %p2011_p12 = scmp.ne.s32.totalorder (!%p2010_p1), %s2001_s25, 0 }
  0x7a   : > { %226 = sbr.rel (%p2010_p1) target bundleno = 2754 (0xac2), region = 36  ;;  %s1113_s7 = sshll.u32 (!%p2010_p1), %s1828_s5, 2 }
  0x7b   : > { %s229_s14 = scalar_lea.sflag (!%p2010_p1), [#allocation3], %s1828_s5  ;;  %s232_s10 = scalar_lea.vmem (!%p2010_p1), [#allocation2], %s1113_s7 }
  0x81   : > { %1538 = dma.done.wait (%p2011_p12), %s229_s14, 64  }
  0x82   : > { %1540 = vsyncadd (%p2011_p12), %s229_s14, 4294967232  ;;  %p2012_p13 = scmp.ne.s32.totalorder %s1999_s23, 0 }
  0x84   : > { %1542 = dma.done.wait (%p2012_p13), [#allocation6], 512  }
  0x85   : > { %1544 = vsyncadd (%p2012_p13), [#allocation6], 4294966784 }
  0x86   : > { %1546 = dma.done.wait (%p2012_p13), [#allocation9], 16  }
  0x87   : > { %1548 = vsyncadd (%p2012_p13), [#allocation9], 4294967280  ;;  %v1583_v0 = vmov 0.0   ;;  %vm1584_vm0 = vmmov 0   ;;  %v1353_v1 = vld [vmem:[#allocation5] sm:$0xff]   ;;  %v1354_v2 = vld [vmem:[#allocation5 + $0x8] sm:$0xff]  }
  0x88   : > { %1165 = vmatprep.subr.bf16.mxu0 %v1583_v0  ;;  %1169 = vmatprep.mubr.msk.bf16.mxu0 %vm1584_vm0, %v1583_v0  ;;  %v270_v3 = vld [vmem:[%s232_s10] sm:$0xf]  ;;  %vm287_vm1 = vcmask 261120   ;;  %s1585_s23 = smov 120   ;;  %s1586_s25 = smov 96   ;;  %vm335_vm2 = vcmask 64512  }
  0x89   : > { %1173 = vmatprep.subr.bf16.mxu1 %v1583_v0  ;;  %1175 = vmatprep.mubr.msk.bf16.mxu1 %vm1584_vm0, %v1583_v0  ;;  %s1587_s27 = smov 88   ;;  %s1588_s24 = smov 64   ;;  %vm400_vm3 = vcmask 1043456   ;;  %v445_v48 = vld [vmem:[#allocation7] sm:$0xf] }
  0x8a   : > { %1166 = vmatpush3.bf16.msra.mxu0 %v1353_v1  ;;  %s1589_s28 = smov 56   ;;  %s1590_s29 = smov 112   ;;  %v609_v49 = vsel %vm400_vm3, %v445_v48, 0  ;;  %v558_v50 = vld [vmem:[#allocation7 + $0x4] sm:$0xf] }
  0x8b   : > { %1167 = vmatprep.subr.bf16.mxu0 %v1583_v0  ;;  %s1591_s6 = smov 80   ;;  %v563_v51 = vsel %vm400_vm3, %v558_v50, 0  ;;  %s1592_s8 = smov 72  }
  0x8c   : > { %s1593_s11 = smov 104   ;;  %s1594_s9 = smov 48  }
  0x8d   : > { %s1595_s13 = smov 40   ;;  %s1117_s21 = sshll.u32 %s1828_s5, 3 }
  0x8e   : > { %1168 = vmatpush3.bf16.msra.mxu0 %v1354_v2  ;;  %s1135_s22 = sshll.u32 %s1567_s18, 7  ;;  %s268_s7 = scalar_lea.vmem [#allocation10], %s1117_s21 }
  0x8f   : > { %1179 = vmatprep.subr.bf16.mxu0 %v1583_v0  ;;  %s995_s14 = sshll.u32 %s268_s7, 4  ;;  %s981_s18 = scalar_lea.sflag [#allocation4], %s1828_s5  ;;  %s1941_s14 = int_to_ptr.vmem [resolvable:$true] %s995_s14 }
  0x91   : > { %1170 = vmatmul.mubr.msk.bf16.vlgmr.msra.gmra.mrb[0].mxu0 %vm287_vm1, %v270_v3 }
  0x92   : > { %1181 = vmatprep.mubr.msk.bf16.mxu0 %vm1584_vm0, %v1583_v0 }
 0x164   : > { %v325_v4 = vpop.f32.mrb[0].mxu0 }
 0x165   : > { %v1855_v5 = vpack.c.bf16 %v325_v4, %v325_v4  ;;  %v1171_v6 = vpop.f32.mrb[1].mxu0 }
 0x166   : > { %v328_v7 = vpop.f32.mrb[2].mxu0 }
 0x167   : > { %446 = vrot.lane.b32.xlu1 %v1855_v5, %s1585_s23  ;;  %333 = vrot.lane.b32.xlu0 %v1855_v5, %s1586_s25  ;;  %v1172_v8 = vpop.f32.mrb[3].mxu0  ;;  %s1939_s25 = scalar_lea.hbm %s1993_s4, %s1135_s22 }
 0x16b   : > { %448 = vrot.lane.b32.xlu0 %v1855_v5, %s1587_s27  ;;  %s1485_s27 = scalar_lea.vmem %s1941_s14, 128 }
 0x16c   : > { %p1486_p11 = scmp.ne.s32.totalorder %s1941_s14, %s1485_s27 }
 0x16e   : > { %p1487_p6 = pnand %p1486_p11, %p1773_p10 }
 0x170   : > { %p1488_p3 = pneg %p1487_p6 }
 0x1d9   : > { %v334_v9 = vpop.permute.xlu0 %333  ;;  %v447_v13 = vpop.permute.xlu1 %446 }
 0x1da   : > { %v340_v10 = vsel %vm335_vm2, %v334_v9, 0 }
 0x1db   : > { %1174 = vmatpush3.bf16.xpose.msra.mxu1 %v340_v10 }
 0x1dc   : > { %1185 = vmatprep.subr.bf16.mxu1 %v1583_v0 }
 0x1dd   : > { %v449_v11 = vpop.permute.xlu0 %448 }
 0x1de   : > { %v454_v12 = vsel %vm335_vm2, %v449_v11, 0 }
 0x1e2   : > { %1176 = vmatmul.mubr.msk.bf16.vlgmr.msra.gmra.mrb[0].mxu1 %vm335_vm2, %v1855_v5 }
 0x1e3   : > { %1186 = vmatpush3.bf16.xpose.msra.mxu1 %v454_v12  ;;  %1187 = vmatprep.mubr.msk.bf16.mxu1 %vm1584_vm0, %v1583_v0 }
 0x1e4   : > { %1197 = vmatprep.subr.bf16.mxu1 %v1583_v0 }
 0x1ea   : > { %1188 = vmatmul.mubr.msk.bf16.vlgmr.msra.gmra.mrb[4].mxu1 %vm335_vm2, %v447_v13 }
 0x1eb   : > { %1199 = vmatprep.mubr.msk.bf16.mxu1 %vm1584_vm0, %v1583_v0  ;;  %1198 = vmatpush3.bf16.msra.mxu1 %v563_v51  ;;  %v923_v51 = vld [vmem:[#allocation7 + $0xc] sm:$0xf] }
 0x1ec   : > { %1209 = vmatprep.subr.bf16.mxu1 %v1583_v0 }
 0x2b5   : > { %v376_v14 = vpop.f32.mrb[0].mxu1 }
 0x2b6   : > { %v382_v15 = vmul.f32 0.17677669, %v376_v14  ;;  %v1177_v16 = vpop.f32.mrb[1].mxu1 }
 0x2b7   : > { %v379_v17 = vpop.f32.mrb[2].mxu1 }
 0x2b8   : > { %v1178_v18 = vpop.f32.mrb[3].mxu1  ;;  %v383_v19 = vsel %vm335_vm2, %v382_v15, -inf }
 0x2b9   : > { %384 = vmax.xlane.f32.xlu1 %v383_v19 }
 0x2bd   : > { %v490_v20 = vpop.f32.mrb[4].mxu1 }
 0x2be   : > { %v496_v21 = vmul.f32 0.17677669, %v490_v20  ;;  %v1189_v22 = vpop.f32.mrb[5].mxu1 }
 0x2bf   : > { %v493_v23 = vpop.f32.mrb[6].mxu1 }
 0x2c0   : > { %v1190_v24 = vpop.f32.mrb[7].mxu1  ;;  %v497_v25 = vsel %vm335_vm2, %v496_v21, -inf }
 0x2c1   : > { %498 = vmax.xlane.f32.xlu0 %v497_v25 }
 0x346   : > { %v385_v26 = vpop.xlane.xlu1 %384 }
 0x347   : > { %v386_v27 = vsub.f32 %v382_v15, %v385_v26 }
 0x349   : > { %v387_v28 = vmul.f32 1.442695, %v386_v27 }
 0x34b   : > { %1355 = vpow2.f32 %v387_v28 }
 0x34e   : > { %v499_v29 = vpop.xlane.xlu0 %498 }
 0x34f   : > { %v500_v30 = vsub.f32 %v496_v21, %v499_v29 }
 0x351   : > { %v501_v31 = vmul.f32 1.442695, %v500_v30 }
 0x353   : > { %1357 = vpow2.f32 %v501_v31 }
 0x355   : > { %v1356_v32 = vpop.eup %1355 }
 0x356   : > { %v389_v33 = vsel %vm335_vm2, %v1356_v32, 0.0 }
 0x357   : > { %390 = vadd.xlane.f32.xlu0 %v389_v33 }
 0x35d   : > { %v1358_v34 = vpop.eup %1357 }
 0x35e   : > { %v503_v35 = vsel %vm335_vm2, %v1358_v34, 0.0 }
 0x35f   : > { %504 = vadd.xlane.f32.xlu1 %v503_v35 }
 0x36d   : > { %395 = vrot.lane.b32.xlu0 %v1855_v5, %s1588_s24  ;;  %s1596_s24 = smov [#allocation10]  }
 0x370   : > { %509 = vrot.lane.b32.xlu1 %v1855_v5, %s1589_s28  ;;  %s1489_s28 = sshll.u32 %s1596_s24, 4  ;;  %s1490_s28 = int_to_ptr.vmem [resolvable:$false] %s1489_s28 }
 0x371   : > { %651 = vrot.lane.b32.xlu0 %v1855_v5, %s1590_s29  ;;  %s1491_s29 = scalar_lea.vmem %s1490_s28, 256  ;;  %p1492_p5 = scmp.lt.s32.totalorder %s1941_s14, %s1490_s28 }
 0x372   : > { %p1493_p7 = scmp.lt.s32.totalorder %s1491_s29, %s1485_s27 }
 0x374   : > { %653 = vrot.lane.b32.xlu1 %v1855_v5, %s1591_s6  ;;  %p1494_p9 = por %p1493_p7, %p1492_p5 }
 0x376   : > { %p1495_p0 = pnand %p1494_p9, %p1488_p3 }
 0x3e4   : > { %v391_v36 = vpop.xlane.xlu0 %390 }
 0x3e5   : > { %1359 = vrcp.f32 %v391_v36 }
 0x3e8   : > { %v396_v37 = vpop.permute.xlu0 %395 }
 0x3e9   : > { %v402_v38 = vsel %vm400_vm3, %v396_v37, 0 }
 0x3ea   : > { %1180 = vmatpush3.bf16.msra.mxu0 %v402_v38 }
 0x3eb   : > { %1191 = vmatprep.subr.bf16.mxu0 %v1583_v0 }
 0x3ec   : > { %v505_v39 = vpop.xlane.xlu1 %504  ;;  %v652_v1 = vpop.permute.xlu0 %651 }
 0x3ed   : > { %1361 = vrcp.f32 %v505_v39 }
 0x3ef   : > { %v1360_v40 = vpop.eup %1359 }
 0x3f0   : > { %v393_v41 = vmul.f32 %v1360_v40, %v1356_v32  ;;  %v510_v42 = vpop.permute.xlu1 %509  ;;  %v763_v32 = vld [vmem:[#allocation7 + $0x8] sm:$0xf] }
 0x3f1   : > { %v515_v44 = vsel %vm400_vm3, %v510_v42, 0  ;;  %v768_v33 = vsel %vm400_vm3, %v763_v32, 0 }
 0x3f2   : > { %v394_v43 = vpack.c.bf16 %v393_v41, %v393_v41 }
 0x3f4   : > { %1182 = vmatmul.mubr.msk.bf16.vlgmr.msra.gmra.mrb[4].mxu0 %vm335_vm2, %v394_v43  ;;  %v654_v57 = vpop.permute.xlu1 %653 }
 0x3f5   : > { %1192 = vmatpush3.bf16.msra.mxu0 %v515_v44  ;;  %1193 = vmatprep.mubr.msk.bf16.mxu0 %vm1584_vm0, %v1583_v0  ;;  %v659_v62 = vsel %vm335_vm2, %v654_v57, 0 }
 0x3f6   : > { %1203 = vmatprep.subr.bf16.mxu0 %v1583_v0 }
 0x3f7   : > { %v1362_v45 = vpop.eup %1361 }
 0x3f8   : > { %v507_v46 = vmul.f32 %v1362_v45, %v1358_v34 }
 0x3fa   : > { %v508_v47 = vpack.c.bf16 %v507_v46, %v507_v46 }
 0x3fc   : > { %1194 = vmatmul.mubr.msk.bf16.vlgmr.msra.gmra.mrb[8].mxu0 %vm335_vm2, %v508_v47 }
 0x3fd   : > { %1205 = vmatprep.mubr.msk.bf16.mxu0 %vm1584_vm0, %v1583_v0  ;;  %1204 = vmatpush3.bf16.msra.mxu0 %v609_v49 }
 0x3fe   : > { %1215 = vmatprep.subr.bf16.mxu0 %v1583_v0 }
 0x4c7   : > { %v438_v52 = vpop.f32.mrb[4].mxu0 }
 0x4c8   : > { %v444_v53 = vpack.c.bf16 %v438_v52, %v438_v52  ;;  %v1183_v54 = vpop.f32.mrb[5].mxu0  ;;  %v928_v52 = vsel %vm400_vm3, %v923_v51, 0 }
 0x4c9   : > { %v441_v55 = vpop.f32.mrb[6].mxu0 }
 0x4ca   : > { %v1184_v56 = vpop.f32.mrb[7].mxu0  ;;  %1206 = vmatmul.mubr.msk.bf16.vlgmr.msra.gmra.mrb[12].mxu0 %vm335_vm2, %v444_v53 }
 0x4cb   : > { %1217 = vmatprep.mubr.msk.bf16.mxu0 %vm1584_vm0, %v1583_v0 }
 0x4cf   : > { %v551_v58 = vpop.f32.mrb[8].mxu0 }
 0x4d0   : > { %v557_v59 = vpack.c.bf16 %v551_v58, %v551_v58  ;;  %v1195_v60 = vpop.f32.mrb[9].mxu0 }
 0x4d1   : > { %v554_v61 = vpop.f32.mrb[10].mxu0 }
 0x4d2   : > { %v1196_v63 = vpop.f32.mrb[11].mxu0  ;;  %1200 = vmatmul.mubr.msk.bf16.vlgmr.msra.gmra.mrb[8].mxu1 %vm335_vm2, %v557_v59 }
 0x4d3   : > { %1210 = vmatpush3.bf16.xpose.msra.mxu1 %v659_v62  ;;  %1211 = vmatprep.mubr.msk.bf16.mxu1 %vm1584_vm0, %v1583_v0 }
 0x4d4   : > { %1221 = vmatprep.subr.bf16.mxu1 %v1583_v0 }
 0x4da   : > { %1212 = vmatmul.mubr.msk.bf16.vlgmr.msra.gmra.mrb[12].mxu1 %vm335_vm2, %v652_v1 }
 0x4db   : > { %1223 = vmatprep.mubr.msk.bf16.mxu1 %vm1584_vm0, %v1583_v0  ;;  %1222 = vmatpush3.bf16.msra.mxu1 %v768_v33 }
 0x4dc   : > { %1233 = vmatprep.subr.bf16.mxu1 %v1583_v0 }
 0x59d   : > { %v645_v2 = vpop.f32.mrb[12].mxu0 }
 0x59e   : > { %v1207_v3 = vpop.f32.mrb[13].mxu0 }
 0x59f   : > { %v648_v4 = vpop.f32.mrb[14].mxu0 }
 0x5a0   : > { %v1208_v6 = vpop.f32.mrb[15].mxu0  ;;  %v1133_v4 = vld [vmem:[#allocation8] ss:$0 sm:$0xff] }
 0x5a5   : > { %v599_v7 = vpop.f32.mrb[8].mxu1 }
 0x5a6   : > { %v1904_v8 = vadd.f32 %v645_v2, %v599_v7  ;;  %v1201_v9 = vpop.f32.mrb[9].mxu1 }
 0x5a7   : > { %v602_v10 = vpop.f32.mrb[10].mxu1 }
 0x5a8   : > { %v1202_v11 = vpop.f32.mrb[11].mxu1 }
 0x5ad   : > { %v695_v12 = vpop.f32.mrb[12].mxu1 }
 0x5ae   : > { %v701_v13 = vmul.f32 0.17677669, %v695_v12  ;;  %v1213_v14 = vpop.f32.mrb[13].mxu1 }
 0x5af   : > { %v698_v15 = vpop.f32.mrb[14].mxu1 }
 0x5b0   : > { %v1214_v16 = vpop.f32.mrb[15].mxu1  ;;  %v702_v17 = vsel %vm335_vm2, %v701_v13, -inf }
 0x5b1   : > { %703 = vmax.xlane.f32.xlu1 %v702_v17 }
 0x5c2   : > { %813 = vrot.lane.b32.xlu1 %v1855_v5, %s1592_s8 }
 0x5c6   : > { %811 = vrot.lane.b32.xlu1 %v1855_v5, %s1593_s11 }
 0x63e   : > { %v704_v18 = vpop.xlane.xlu1 %703 }
 0x63f   : > { %v705_v19 = vsub.f32 %v701_v13, %v704_v18 }
 0x641   : > { %v706_v20 = vmul.f32 1.442695, %v705_v19 }
 0x642   : > { %v814_v28 = vpop.permute.xlu1 %813 }
 0x643   : > { %1363 = vpow2.f32 %v706_v20  ;;  %v819_v30 = vsel %vm335_vm2, %v814_v28, 0 }
 0x646   : > { %v812_v31 = vpop.permute.xlu1 %811 }
 0x64d   : > { %v1364_v21 = vpop.eup %1363 }
 0x64e   : > { %v708_v22 = vsel %vm335_vm2, %v1364_v21, 0.0 }
 0x64f   : > { %709 = vadd.xlane.f32.xlu0 %v708_v22 }
 0x665   : > { %714 = vrot.lane.b32.xlu0 %v1855_v5, %s1594_s9 }
 0x6dc   : > { %v710_v23 = vpop.xlane.xlu0 %709 }
 0x6dd   : > { %1365 = vrcp.f32 %v710_v23 }
 0x6e0   : > { %v715_v24 = vpop.permute.xlu0 %714 }
 0x6e1   : > { %v720_v25 = vsel %vm400_vm3, %v715_v24, 0 }
 0x6e2   : > { %1216 = vmatpush3.bf16.msra.mxu0 %v720_v25 }
 0x6e3   : > { %1227 = vmatprep.subr.bf16.mxu0 %v1583_v0 }
 0x6e7   : > { %v1366_v26 = vpop.eup %1365 }
 0x6e8   : > { %v712_v27 = vmul.f32 %v1366_v26, %v1364_v21 }
 0x6ea   : > { %v713_v29 = vpack.c.bf16 %v712_v27, %v712_v27 }
 0x6ec   : > { %1218 = vmatmul.mubr.msk.bf16.vlgmr.msra.gmra.mrb[16].mxu0 %vm335_vm2, %v713_v29 }
 0x6ed   : > { %1228 = vmatpush3.bf16.xpose.msra.mxu0 %v819_v30  ;;  %1229 = vmatprep.mubr.msk.bf16.mxu0 %vm1584_vm0, %v1583_v0 }
 0x6ee   : > { %1239 = vmatprep.subr.bf16.mxu0 %v1583_v0 }
 0x6f4   : > { %1230 = vmatmul.mubr.msk.bf16.vlgmr.msra.gmra.mrb[20].mxu0 %vm335_vm2, %v812_v31 }
 0x6f5   : > { %1241 = vmatprep.mubr.msk.bf16.mxu0 %vm1584_vm0, %v1583_v0  ;;  %1240 = vmatpush3.bf16.msra.mxu0 %v928_v52 }
 0x7bf   : > { %v756_v34 = vpop.f32.mrb[16].mxu0 }
 0x7c0   : > { %v762_v35 = vpack.c.bf16 %v756_v34, %v756_v34  ;;  %v1219_v36 = vpop.f32.mrb[17].mxu0 }
 0x7c1   : > { %v759_v37 = vpop.f32.mrb[18].mxu0 }
 0x7c2   : > { %v1220_v38 = vpop.f32.mrb[19].mxu0  ;;  %1224 = vmatmul.mubr.msk.bf16.vlgmr.msra.gmra.mrb[16].mxu1 %vm335_vm2, %v762_v35 }
 0x7c3   : > { %1235 = vmatprep.mubr.msk.bf16.mxu1 %vm1584_vm0, %v1583_v0 }
 0x7c7   : > { %v855_v39 = vpop.f32.mrb[20].mxu0 }
 0x7c8   : > { %v861_v40 = vmul.f32 0.17677669, %v855_v39  ;;  %v1231_v41 = vpop.f32.mrb[21].mxu0 }
 0x7c9   : > { %v858_v42 = vpop.f32.mrb[22].mxu0 }
 0x7ca   : > { %v1232_v43 = vpop.f32.mrb[23].mxu0  ;;  %v862_v44 = vsel %vm335_vm2, %v861_v40, -inf }
 0x7cb   : > { %863 = vmax.xlane.f32.xlu0 %v862_v44 }
 0x7e1   : > { %874 = vrot.lane.b32.xlu0 %v1855_v5, %s1595_s13 }
 0x858   : > { %v864_v45 = vpop.xlane.xlu0 %863 }
 0x859   : > { %v865_v46 = vsub.f32 %v861_v40, %v864_v45 }
 0x85b   : > { %v866_v47 = vmul.f32 1.442695, %v865_v46 }
 0x85c   : > { %v875_v48 = vpop.permute.xlu0 %874 }
 0x85d   : > { %1367 = vpow2.f32 %v866_v47  ;;  %v880_v49 = vsel %vm400_vm3, %v875_v48, 0 }
 0x85e   : > { %1234 = vmatpush3.bf16.msra.mxu1 %v880_v49 }
 0x867   : > { %v1368_v0 = vpop.eup %1367 }
 0x868   : > { %v868_v50 = vsel %vm335_vm2, %v1368_v0, 0.0 }
 0x869   : > { %869 = vadd.xlane.f32.xlu1 %v868_v50 }
 0x895   : > { %v804_v53 = vpop.f32.mrb[16].mxu1 }
 0x896   : > { %v810_v54 = vadd.f32 %v804_v53, %v1904_v8  ;;  %v1225_v5 = vpop.f32.mrb[17].mxu1 }
 0x897   : > { %v807_v55 = vpop.f32.mrb[18].mxu1 }
 0x898   : > { %v1226_v56 = vpop.f32.mrb[19].mxu1 }
 0x8f6   : > { %v870_v57 = vpop.xlane.xlu1 %869 }
 0x8f7   : > { %1369 = vrcp.f32 %v870_v57 }
 0x901   : > { %v1370_v58 = vpop.eup %1369 }
 0x902   : > { %v872_v59 = vmul.f32 %v1370_v58, %v1368_v0 }
 0x904   : > { %v873_v60 = vpack.c.bf16 %v872_v59, %v872_v59 }
 0x906   : > { %1236 = vmatmul.mubr.msk.bf16.vlgmr.msra.gmra.mrb[20].mxu1 %vm335_vm2, %v873_v60 }
 0x9d9   : > { %v916_v61 = vpop.f32.mrb[20].mxu1 }
 0x9da   : > { %v922_v62 = vpack.c.bf16 %v916_v61, %v916_v61  ;;  %v1237_v63 = vpop.f32.mrb[21].mxu1 }
 0x9db   : > { %v919_v1 = vpop.f32.mrb[22].mxu1 }
 0x9dc   : > { %v1238_v2 = vpop.f32.mrb[23].mxu1  ;;  %1242 = vmatmul.mubr.msk.bf16.vlgmr.msra.gmra.mrb[24].mxu0 %vm335_vm2, %v922_v62 }
 0xaaf   : > { %v964_v3 = vpop.f32.mrb[24].mxu0 }
 0xab0   : > { %v970_v6 = vadd.f32 %v964_v3, %v810_v54  ;;  %v1243_v7 = vpop.f32.mrb[25].mxu0 }
 0xab1   : > { %v967_v8 = vpop.f32.mrb[26].mxu0 }
 0xab2   : > { %v978_v9 = vadd.f32 %v1133_v4, %v970_v6  ;;  %v1244_v10 = vpop.f32.mrb[27].mxu0 }
 0xab4   : > { %979 = vst.msk [vmem:[%s268_s7] sm:$0xff] %vm287_vm1, %v978_v9 }
 0xab5   : > { %1498 = shalt.err (!%p1495_p0)
}
 0xab6   : > { %s1499_s5 = scalar_lea.hbm %s1939_s25, 128  ;;  %s1503_s11 = scalar_lea.hbm %s1993_s4, 256 }
 0xab7   : > { %p1500_p4 = scmp.ne.s32.totalorder %s1939_s25, %s1499_s5  ;;  %p1504_p1 = scmp.lt.u32.totalorder %s1939_s25, %s1993_s4 }
 0xab8   : > { %p1505_p12 = scmp.lt.u32.totalorder %s1503_s11, %s1499_s5  ;;  %p1507_p11 = scmp.lt.u32.totalorder %s1499_s5, %s1939_s25 }
 0xab9   : > { %p1501_p2 = pnand %p1500_p4, %p1773_p10 }
 0xaba   : > { %p1506_p13 = por %p1505_p12, %p1504_p1 }
 0xabb   : > { %p1502_p8 = pneg %p1501_p2 }
 0xabc   : > { %p1508_p6 = por %p1507_p11, %p1506_p13 }
 0xabe   : > { %p1509_p3 = pnand %p1508_p6, %p1502_p8 }
 0xac0   : > { %1512 = shalt.err (!%p1509_p3)
}
 0xac1   : > { %1259 = dma.vmem_to_hbm [thread:$0]  (%p1773_p10), %s1941_s14, 128, %s1939_s25, %s981_s18  }
 0xac2 PF: > { %s2013_s21 = sld [smem:[#allocation15_spill]]  ;;  %s1007_s22 = sand.u32 1, %s1555_s15  }
 0xac3   : > { %p2015_p7 = scmp.ge.s32.totalorder %s1575_s20, 2  ;;  %s1008_s7 = scalar_lea.sflag [#allocation4], %s1007_s22 }
 0xac8   : > { %p2014_p5 = scmp.ne.s32.totalorder %s2013_s21, 0 }
 0xaca   : > { %p1276_p9 = pnand %p2015_p7, %p2014_p5 }
 0xacc   : > { %1550 = dma.done.wait (!%p1276_p9), %s1008_s7, 128  }
 0xacd   : > { %1552 = vsyncadd (!%p1276_p9), %s1008_s7, 4294967168  ;;  %s22_s20 = sadd.s32 1, %s1575_s20   ;;  %s2016_s15 = smov %s1559_s16 }
 0xace   : > { %p19_p0 = scmp.ge.s32.totalorder %s22_s20, 4   ;;  %s2017_s16 = smov %s1563_s17 }
 0xacf   : > { %s2018_s17 = smov %s1785_s12  ;;  %s2019_s18 = smov %s1571_s19 }
 0xad0   : > { %s2020_s19 = smov %s2022_s26  ;;  %21 = sbr.rel (!%p19_p0) target bundleno = 8 (0x8), region = 93 }
 0xad7   :  { %1013 = vsyncpa [#allocation3], 1 }
 0xad8   :  { %1015 = vsyncpa [#allocation3 + $0x1], 1 }
 0xad9   :  { %1016 = vsyncpa [#allocation6], 1 }
 0xada   :  { %1017 = vsyncpa [#allocation9], 1 }
 0xadb   :  { %1018 = vsyncpa [#allocation4], 1 }
 0xadc   :  { %1020 = vsyncpa [#allocation4 + $0x1], 1 }

</bundles_post_ra>
